<compile_context>
chip_gen: v7x
topology: tpu7x:2x2x1
jax: 0.10.0
libtpu: 0.0.40
codegen_flags: <defaults>
</compile_context>

<pallas_src>
import functools

import jax
import jax.numpy as jnp
from jax.experimental import pallas as pl
from jax.experimental.pallas import tpu as pltpu

BN_EPS = 1e-4


# ----------------------------------------------------------------------------
# In-kernel helpers
# ----------------------------------------------------------------------------
def _lane_periodic_sum(row, period):
    """row: (1, L). Each output lane j holds sum over lanes j' ≡ j (mod period).
    Requires L / period to be a power of two. Uses cyclic pltpu.roll (XLU)."""
    L = row.shape[-1]
    shift = L // 2
    while shift >= period:
        row = row + pltpu.roll(row, shift, 1)
        shift //= 2
    return row


def _bn_relu_lane_dense(acc, gamma_b, beta_b, *, n_samples, cy):
    """acc: (R, W*Cy) f32 with channel co at lanes w*Cy+co.
    gamma_b / beta_b: (1, W*Cy), per-channel params pre-tiled along W.
    BatchNorm in training-mode semantics (batch stats, biased variance)."""
    inv_n = 1.0 / float(n_samples)
    colsum = jnp.sum(acc, axis=0, keepdims=True)              # (1, W*Cy)
    mean_b = _lane_periodic_sum(colsum, cy) * inv_n           # per-channel mean, broadcast
    d = acc - mean_b                                          # two-pass variance
    colsq = jnp.sum(d * d, axis=0, keepdims=True)
    var_b = _lane_periodic_sum(colsq, cy) * inv_n
    y = d * (gamma_b * jax.lax.rsqrt(var_b + BN_EPS)) + beta_b
    return jnp.maximum(y, 0.0)                                # ReLU


# ----------------------------------------------------------------------------
# Fused StackEncoderOrg kernel
# ----------------------------------------------------------------------------
def _stack_encoder_kernel(x_ref, w1_ref, g1_ref, b1_ref, w2_ref, g2_ref,
                          b2_ref, selp_ref, y_ref, ys_ref, xp_ref, y1p_ref,
                          *, N, H, W, Cin, Cy, KH):
    R = N * H
    WCi = W * Cin
    WC = W * Cy
    WoC = (W // 2) * Cy
    n_samples = N * H * W
    pad = (KH - 1) // 2

    # ---- conv1: H halo in scratch (zero ONLY the halo rows); SAME zero
    #      padding along W lives in the banded weights. Single MXU matmul with
    #      the KH shifted views concatenated along the contraction axis. ----
    xp_ref[:, 0:pad, :] = jnp.zeros((N, pad, WCi), xp_ref.dtype)
    xp_ref[:, H + pad:H + 2 * pad, :] = jnp.zeros((N, pad, WCi), xp_ref.dtype)
    xp_ref[:, pad:pad + H, :] = x_ref[...]
    lhs1 = jnp.concatenate(
        [xp_ref[:, kh:kh + H, :].reshape(R, WCi) for kh in range(KH)], axis=1)
    acc1 = jnp.dot(lhs1.astype(jnp.bfloat16), w1_ref[...],
                   preferred_element_type=jnp.float32)         # (R, WC) f32
    y1 = _bn_relu_lane_dense(acc1, g1_ref[...], b1_ref[...],
                             n_samples=n_samples, cy=Cy)

    # ---- conv2: intermediate never leaves VMEM. ----
    y1p_ref[:, 0:pad, :] = jnp.zeros((N, pad, WC), y1p_ref.dtype)
    y1p_ref[:, H + pad:H + 2 * pad, :] = jnp.zeros((N, pad, WC), y1p_ref.dtype)
    y1p_ref[:, pad:pad + H, :] = y1.reshape(N, H, WC)
    lhs2 = jnp.concatenate(
        [y1p_ref[:, kh:kh + H, :].reshape(R, WC) for kh in range(KH)], axis=1)
    acc2 = jnp.dot(lhs2.astype(jnp.bfloat16), w2_ref[...],
                   preferred_element_type=jnp.float32)         # (R, WC) f32
    y2 = _bn_relu_lane_dense(acc2, g2_ref[...], b2_ref[...],
                             n_samples=n_samples, cy=Cy)

    # ---- store conv2 output (lane-dense, unmasked stores). ----
    y_ref[...] = y2.reshape(N, H, WC).astype(y_ref.dtype)

    # ---- 2x2 / stride-2 max pool on the in-register y2 (f32). ----
    Ho = H // 2
    y2r = y2.reshape(N * Ho, 2, WC)
    mh = jnp.maximum(y2r[:, 0, :], y2r[:, 1, :])               # H-pair max (N*Ho, WC)
    mh2 = mh.reshape(N * Ho // 2, 2 * WC)                      # fold Ho pairs into lanes
    sel = jnp.dot(mh2, selp_ref[...],                          # even/odd W picks
                  preferred_element_type=jnp.float32)          # (N*Ho/2, 4*WoC)
    ys = jnp.maximum(sel[:, :2 * WoC], sel[:, 2 * WoC:])       # W-pair max, 128 lanes
    ys_ref[...] = ys.reshape(N, Ho // 2, 2 * WoC).astype(ys_ref.dtype)


# ----------------------------------------------------------------------------
# One-time parameter preparation (hoisted out of the per-call path)
# ----------------------------------------------------------------------------
def _band_weights(w_hwio, W):
    """Fold KW taps + SAME zero-padding along W into banded matrices:
    B[kh, w_in*Cin+ci, w_out*Cout+co] = w[kh, w_in-w_out+pad, ci, co]."""
    KH, KW, _, _ = w_hwio.shape
    pad = (KW - 1) // 2
    mats = []
    for kh in range(KH):
        blk = None
        for kw in range(KW):
            band = jnp.eye(W, k=pad - kw, dtype=jnp.float32)   # w_out = w_in + pad - kw
            term = jnp.kron(band, w_hwio[kh, kw].astype(jnp.float32))
            blk = term if blk is None else blk + term
        mats.append(blk)
    return jnp.stack(mats)                                     # (KH, W*Cin, W*Cout)


def _pool_select_mat(W, C):
    """0/1 matrix (2*W*C, 4*(W//2)*C): columns [0, 2*WoC) select even-w blocks
    of the two Ho-parity lane-halves, columns [2*WoC, 4*WoC) select odd-w."""
    Wo = W // 2
    rows = jnp.arange(W)[:, None]
    cols = jnp.arange(Wo)[None, :]
    even = (rows == 2 * cols).astype(jnp.float32)
    odd = (rows == 2 * cols + 1).astype(jnp.float32)
    eye_c = jnp.eye(C, dtype=jnp.float32)
    sele = jnp.kron(even, eye_c)                               # (W*C, Wo*C)
    selo = jnp.kron(odd, eye_c)
    eye2 = jnp.eye(2, dtype=jnp.float32)
    return jnp.concatenate([jnp.kron(eye2, sele), jnp.kron(eye2, selo)], axis=1)


def prepare_stack_encoder_params(w1, g1, b1, w2, g2, b2, W):
    """Run ONCE per set of module parameters (not on every forward call)."""
    KH, KW, Cin, Cy = w1.shape
    w1f = _band_weights(w1, W).reshape(KH * W * Cin, W * Cy).astype(jnp.bfloat16)
    w2f = _band_weights(w2, W).reshape(KH * W * Cy, W * Cy).astype(jnp.bfloat16)
    g1b = jnp.tile(g1.reshape(1, Cy).astype(jnp.float32), (1, W))
    b1b = jnp.tile(b1.reshape(1, Cy).astype(jnp.float32), (1, W))
    g2b = jnp.tile(g2.reshape(1, Cy).astype(jnp.float32), (1, W))
    b2b = jnp.tile(b2.reshape(1, Cy).astype(jnp.float32), (1, W))
    selp = _pool_select_mat(W, Cy)                             # f32, pool stays f32
    return (w1f, g1b, b1b, w2f, g2b, b2b, selp)


# ----------------------------------------------------------------------------
# StackEncoderOrg forward (NCHW in / NCHW out, like PyTorch)
# ----------------------------------------------------------------------------
@jax.jit
def stack_encoder_org_fwd(x_nchw, w1f, g1b, b1b, w2f, g2b, b2b, selp):
    N, Cin, H, W = x_nchw.shape
    WC = g1b.shape[1]
    assert WC % W == 0
    Cy = WC // W
    KH = w1f.shape[0] // (W * Cin)
    # Butterfly BN reduce needs power-of-two W; Ho lane-fold needs H % 4 == 0.
    assert H % 4 == 0 and W % 2 == 0 and (W & (W - 1)) == 0
    Ho, Wo = H // 2, W // 2

    # Lane-dense NHWC-flat input (N, H, W*Cin); the H halo is added in-kernel.
    x_flat = jnp.transpose(x_nchw, (0, 2, 3, 1)).reshape(N, H, W * Cin)
    x_flat = x_flat.astype(jnp.float32)

    kernel = functools.partial(_stack_encoder_kernel, N=N, H=H, W=W,
                               Cin=Cin, Cy=Cy, KH=KH)
    vmem = pl.BlockSpec(memory_space=pltpu.MemorySpace.VMEM)
    y_flat, ys_flat = pl.pallas_call(
        kernel,
        out_shape=(jax.ShapeDtypeStruct((N, H, WC), jnp.float32),
                   jax.ShapeDtypeStruct((N, Ho // 2, 2 * Wo * Cy), jnp.float32)),
        in_specs=[vmem] * 8,
        out_specs=(vmem, vmem),
        scratch_shapes=[pltpu.VMEM((N, H + KH - 1, W * Cin), jnp.float32),
                        pltpu.VMEM((N, H + KH - 1, WC), jnp.float32)],
    )(x_flat, w1f, g1b, b1b, w2f, g2b, b2b, selp)

    # Tiny XLA permutes / un-folds on the lane-dense kernel outputs.
    y = y_flat.reshape(N, H, W, Cy).transpose(0, 3, 1, 2)
    ys = ys_flat.reshape(N, Ho, Wo, Cy).transpose(0, 3, 1, 2)
    return y, ys


# ----------------------------------------------------------------------------
# Pure-JAX reference (sanity check)
# ----------------------------------------------------------------------------
def _ref_forward(x_nchw, w1, g1, b1, w2, g2, b2):
    def cbr(x, w, g, b):
        y = jax.lax.conv_general_dilated(
            x, w, window_strides=(1, 1), padding="SAME",
            dimension_numbers=("NCHW", "HWIO", "NCHW"))
        mean = y.mean(axis=(0, 2, 3), keepdims=True)
        var = ((y - mean) ** 2).mean(axis=(0, 2, 3), keepdims=True)
        y = (y - mean) * jax.lax.rsqrt(var + BN_EPS)
        y = y * g.reshape(1, -1, 1, 1) + b.reshape(1, -1, 1, 1)
        return jnp.maximum(y, 0.0)

    y = cbr(cbr(x_nchw, w1, g1, b1), w2, g2, b2)
    y_small = jax.lax.reduce_window(y, -jnp.inf, jax.lax.max,
                                    (1, 1, 2, 2), (1, 1, 2, 2), "VALID")
    return y, y_small


if __name__ == "__main__":
    # Module config: StackEncoderOrg(x_channels=4, y_channels=8, kernel_size=3)
    N, Cx, Cy, H, W, K = 2, 4, 8, 16, 16, 3

    key = jax.random.PRNGKey(0)
    k1, k2, kx = jax.random.split(key, 3)
    # Conv weights in HWIO, no bias; BN gamma/beta at PyTorch defaults (1 / 0).
    w1 = jax.random.normal(k1, (K, K, Cx, Cy), jnp.float32) * 0.1
    w2 = jax.random.normal(k2, (K, K, Cy, Cy), jnp.float32) * 0.1
    g1 = jnp.ones((Cy,), jnp.float32)
    b1 = jnp.zeros((Cy,), jnp.float32)
    g2 = jnp.ones((Cy,), jnp.float32)
    b2 = jnp.zeros((Cy,), jnp.float32)

    x = jax.random.normal(kx, (N, Cx, H, W), jnp.float32)

    # Prepare banded weights / selection matrix ONCE (hoisted out of the call).
    params = prepare_stack_encoder_params(w1, g1, b1, w2, g2, b2, W)
    params = jax.block_until_ready(params)

    y, y_small = stack_encoder_org_fwd(x, *params)
    jax.block_until_ready((y, y_small))

    # Sanity check against a plain-JAX f32 reference. Tolerance is loosened
    # relative to a pure-f32 kernel because the conv MXU operands are bf16.
    y_ref, y_small_ref = _ref_forward(x, w1, g1, b1, w2, g2, b2)
    assert y.shape == (N, Cy, H, W) and y_small.shape == (N, Cy, H // 2, W // 2)
    assert jnp.allclose(y, y_ref, atol=5e-2, rtol=5e-2)
    assert jnp.allclose(y_small, y_small_ref, atol=5e-2, rtol=5e-2)

    print("KERNEL_OK")
</pallas_src>

<mosaic_0001>
module attributes {stable_mosaic.version = 11 : i64} {
  func.func @_stack_encoder_kernel(%arg0: memref<2x16x64xf32, #tpu.memory_space<vmem>>, %arg1: memref<192x128xbf16, #tpu.memory_space<vmem>>, %arg2: memref<1x128xf32, #tpu.memory_space<vmem>>, %arg3: memref<1x128xf32, #tpu.memory_space<vmem>>, %arg4: memref<384x128xbf16, #tpu.memory_space<vmem>>, %arg5: memref<1x128xf32, #tpu.memory_space<vmem>>, %arg6: memref<1x128xf32, #tpu.memory_space<vmem>>, %arg7: memref<256x256xf32, #tpu.memory_space<vmem>>, %arg8: memref<2x16x128xf32, #tpu.memory_space<vmem>>, %arg9: memref<2x4x128xf32, #tpu.memory_space<vmem>>, %arg10: memref<2x18x64xf32, #tpu.memory_space<vmem>>, %arg11: memref<2x18x128xf32, #tpu.memory_space<vmem>>) attributes {dimension_semantics = [], scalar_prefetch = 0 : i64, scratch_operands = 2 : i64, tpu.core_type = #tpu.core_type<tc>} {
    %cst = arith.constant 0.000000e+00 : f32
    %0 = vector.broadcast %cst : f32 to vector<2x1x64xf32>
    %c0 = arith.constant 0 : index
    %c0_0 = arith.constant 0 : index
    %c0_1 = arith.constant 0 : index
    %1 = vector.load %arg10[%c0, %c0_0, %c0_1] : memref<2x18x64xf32, #tpu.memory_space<vmem>>, vector<2x1x64xf32>
    tpu.vector_store %arg10[%c0, %c0_0, %c0_1], %0 {strides = array<i32>} : memref<2x18x64xf32, #tpu.memory_space<vmem>>, vector<2x1x64xf32>,
    %cst_2 = arith.constant 0.000000e+00 : f32
    %2 = vector.broadcast %cst_2 : f32 to vector<2x1x64xf32>
    %c0_3 = arith.constant 0 : index
    %c17 = arith.constant 17 : index
    %c0_4 = arith.constant 0 : index
    %3 = vector.load %arg10[%c0_3, %c17, %c0_4] : memref<2x18x64xf32, #tpu.memory_space<vmem>>, vector<2x1x64xf32>
    tpu.vector_store %arg10[%c0_3, %c17, %c0_4], %2 {strides = array<i32>} : memref<2x18x64xf32, #tpu.memory_space<vmem>>, vector<2x1x64xf32>,
    %c0_5 = arith.constant 0 : index
    %c0_6 = arith.constant 0 : index
    %c0_7 = arith.constant 0 : index
    %4 = vector.load %arg0[%c0_5, %c0_6, %c0_7] : memref<2x16x64xf32, #tpu.memory_space<vmem>>, vector<2x16x64xf32>
    %c0_8 = arith.constant 0 : index
    %c1 = arith.constant 1 : index
    %c0_9 = arith.constant 0 : index
    %5 = vector.load %arg10[%c0_8, %c1, %c0_9] : memref<2x18x64xf32, #tpu.memory_space<vmem>>, vector<2x16x64xf32>
    tpu.vector_store %arg10[%c0_8, %c1, %c0_9], %4 {strides = array<i32>} : memref<2x18x64xf32, #tpu.memory_space<vmem>>, vector<2x16x64xf32>,
    %c0_10 = arith.constant 0 : index
    %c0_11 = arith.constant 0 : index
    %c0_12 = arith.constant 0 : index
    %6 = vector.load %arg10[%c0_10, %c0_11, %c0_12] : memref<2x18x64xf32, #tpu.memory_space<vmem>>, vector<2x16x64xf32>
    %7 = vector.shape_cast %6 : vector<2x16x64xf32> to vector<32x64xf32>
    %c0_13 = arith.constant 0 : index
    %c1_14 = arith.constant 1 : index
    %c0_15 = arith.constant 0 : index
    %8 = vector.load %arg10[%c0_13, %c1_14, %c0_15] : memref<2x18x64xf32, #tpu.memory_space<vmem>>, vector<2x16x64xf32>
    %9 = vector.shape_cast %8 : vector<2x16x64xf32> to vector<32x64xf32>
    %c0_16 = arith.constant 0 : index
    %c2 = arith.constant 2 : index
    %c0_17 = arith.constant 0 : index
    %10 = vector.load %arg10[%c0_16, %c2, %c0_17] : memref<2x18x64xf32, #tpu.memory_space<vmem>>, vector<2x16x64xf32>
    %11 = vector.shape_cast %10 : vector<2x16x64xf32> to vector<32x64xf32>
    %12 = tpu.concatenate %7, %9, %11 in 1 : vector<32x64xf32>, vector<32x64xf32>, vector<32x64xf32> -> vector<32x192xf32>
    %13 = arith.truncf %12 : vector<32x192xf32> to vector<32x192xbf16>
    %c0_18 = arith.constant 0 : index
    %c0_19 = arith.constant 0 : index
    %14 = vector.load %arg1[%c0_18, %c0_19] : memref<192x128xbf16, #tpu.memory_space<vmem>>, vector<192x128xbf16>
    %cst_20 = arith.constant dense<0.000000e+00> : vector<32x128xf32>
    %15 = tpu.matmul %13, %14, %cst_20 {dimension_numbers = #tpu.dot_dimension_numbers<[1], [0], [0], [1], [0, 0, 1, 1], [], []>} : vector<32x192xbf16>, vector<192x128xbf16>, vector<32x128xf32> -> vector<32x128xf32>
    %c0_21 = arith.constant 0 : index
    %c0_22 = arith.constant 0 : index
    %16 = vector.load %arg2[%c0_21, %c0_22] : memref<1x128xf32, #tpu.memory_space<vmem>>, vector<1x128xf32>
    %c0_23 = arith.constant 0 : index
    %c0_24 = arith.constant 0 : index
    %17 = vector.load %arg3[%c0_23, %c0_24] : memref<1x128xf32, #tpu.memory_space<vmem>>, vector<1x128xf32>
    %cst_25 = arith.constant dense<0.000000e+00> : vector<128xf32>
    %18 = vector.multi_reduction <add>, %15, %cst_25 [0] : vector<32x128xf32> to vector<128xf32>
    %19 = vector.shape_cast %18 : vector<128xf32> to vector<1x128xf32>
    %c64_i32 = arith.constant 64 : i32
    %20 = tpu.dynamic_rotate %19 by %c64_i32 dim 1 : vector<1x128xf32>, i32 -> vector<1x128xf32>
    %21 = arith.addf %19, %20 : vector<1x128xf32>
    %c32_i32 = arith.constant 32 : i32
    %22 = tpu.dynamic_rotate %21 by %c32_i32 dim 1 : vector<1x128xf32>, i32 -> vector<1x128xf32>
    %23 = arith.addf %21, %22 : vector<1x128xf32>
    %c16_i32 = arith.constant 16 : i32
    %24 = tpu.dynamic_rotate %23 by %c16_i32 dim 1 : vector<1x128xf32>, i32 -> vector<1x128xf32>
    %25 = arith.addf %23, %24 : vector<1x128xf32>
    %c8_i32 = arith.constant 8 : i32
    %26 = tpu.dynamic_rotate %25 by %c8_i32 dim 1 : vector<1x128xf32>, i32 -> vector<1x128xf32>
    %27 = arith.addf %25, %26 : vector<1x128xf32>
    %cst_26 = arith.constant 0.001953125 : f32
    %28 = vector.broadcast %cst_26 : f32 to vector<1x128xf32>
    %29 = arith.mulf %27, %28 : vector<1x128xf32>
    %30 = vector.broadcast %29 : vector<1x128xf32> to vector<32x128xf32>
    %31 = arith.subf %15, %30 : vector<32x128xf32>
    %32 = arith.mulf %31, %31 : vector<32x128xf32>
    %cst_27 = arith.constant dense<0.000000e+00> : vector<128xf32>
    %33 = vector.multi_reduction <add>, %32, %cst_27 [0] : vector<32x128xf32> to vector<128xf32>
    %34 = vector.shape_cast %33 : vector<128xf32> to vector<1x128xf32>
    %c64_i32_28 = arith.constant 64 : i32
    %35 = tpu.dynamic_rotate %34 by %c64_i32_28 dim 1 : vector<1x128xf32>, i32 -> vector<1x128xf32>
    %36 = arith.addf %34, %35 : vector<1x128xf32>
    %c32_i32_29 = arith.constant 32 : i32
    %37 = tpu.dynamic_rotate %36 by %c32_i32_29 dim 1 : vector<1x128xf32>, i32 -> vector<1x128xf32>
    %38 = arith.addf %36, %37 : vector<1x128xf32>
    %c16_i32_30 = arith.constant 16 : i32
    %39 = tpu.dynamic_rotate %38 by %c16_i32_30 dim 1 : vector<1x128xf32>, i32 -> vector<1x128xf32>
    %40 = arith.addf %38, %39 : vector<1x128xf32>
    %c8_i32_31 = arith.constant 8 : i32
    %41 = tpu.dynamic_rotate %40 by %c8_i32_31 dim 1 : vector<1x128xf32>, i32 -> vector<1x128xf32>
    %42 = arith.addf %40, %41 : vector<1x128xf32>
    %cst_32 = arith.constant 0.001953125 : f32
    %43 = vector.broadcast %cst_32 : f32 to vector<1x128xf32>
    %44 = arith.mulf %42, %43 : vector<1x128xf32>
    %cst_33 = arith.constant 9.99999974E-5 : f32
    %45 = vector.broadcast %cst_33 : f32 to vector<1x128xf32>
    %46 = arith.addf %44, %45 : vector<1x128xf32>
    %47 = math.rsqrt %46 : vector<1x128xf32>
    %48 = arith.mulf %16, %47 : vector<1x128xf32>
    %49 = vector.broadcast %48 : vector<1x128xf32> to vector<32x128xf32>
    %50 = arith.mulf %31, %49 : vector<32x128xf32>
    %51 = vector.broadcast %17 : vector<1x128xf32> to vector<32x128xf32>
    %52 = arith.addf %50, %51 : vector<32x128xf32>
    %cst_34 = arith.constant 0.000000e+00 : f32
    %53 = vector.broadcast %cst_34 : f32 to vector<32x128xf32>
    %54 = arith.maximumf %52, %53 : vector<32x128xf32>
    %cst_35 = arith.constant 0.000000e+00 : f32
    %55 = vector.broadcast %cst_35 : f32 to vector<2x1x128xf32>
    %c0_36 = arith.constant 0 : index
    %c0_37 = arith.constant 0 : index
    %c0_38 = arith.constant 0 : index
    %56 = vector.load %arg11[%c0_36, %c0_37, %c0_38] : memref<2x18x128xf32, #tpu.memory_space<vmem>>, vector<2x1x128xf32>
    tpu.vector_store %arg11[%c0_36, %c0_37, %c0_38], %55 {strides = array<i32>} : memref<2x18x128xf32, #tpu.memory_space<vmem>>, vector<2x1x128xf32>,
    %cst_39 = arith.constant 0.000000e+00 : f32
    %57 = vector.broadcast %cst_39 : f32 to vector<2x1x128xf32>
    %c0_40 = arith.constant 0 : index
    %c17_41 = arith.constant 17 : index
    %c0_42 = arith.constant 0 : index
    %58 = vector.load %arg11[%c0_40, %c17_41, %c0_42] : memref<2x18x128xf32, #tpu.memory_space<vmem>>, vector<2x1x128xf32>
    tpu.vector_store %arg11[%c0_40, %c17_41, %c0_42], %57 {strides = array<i32>} : memref<2x18x128xf32, #tpu.memory_space<vmem>>, vector<2x1x128xf32>,
    %59 = vector.shape_cast %54 : vector<32x128xf32> to vector<2x16x128xf32>
    %c0_43 = arith.constant 0 : index
    %c1_44 = arith.constant 1 : index
    %c0_45 = arith.constant 0 : index
    %60 = vector.load %arg11[%c0_43, %c1_44, %c0_45] : memref<2x18x128xf32, #tpu.memory_space<vmem>>, vector<2x16x128xf32>
    tpu.vector_store %arg11[%c0_43, %c1_44, %c0_45], %59 {strides = array<i32>} : memref<2x18x128xf32, #tpu.memory_space<vmem>>, vector<2x16x128xf32>,
    %c0_46 = arith.constant 0 : index
    %c0_47 = arith.constant 0 : index
    %c0_48 = arith.constant 0 : index
    %61 = vector.load %arg11[%c0_46, %c0_47, %c0_48] : memref<2x18x128xf32, #tpu.memory_space<vmem>>, vector<2x16x128xf32>
    %62 = vector.shape_cast %61 : vector<2x16x128xf32> to vector<32x128xf32>
    %c0_49 = arith.constant 0 : index
    %c1_50 = arith.constant 1 : index
    %c0_51 = arith.constant 0 : index
    %63 = vector.load %arg11[%c0_49, %c1_50, %c0_51] : memref<2x18x128xf32, #tpu.memory_space<vmem>>, vector<2x16x128xf32>
    %64 = vector.shape_cast %63 : vector<2x16x128xf32> to vector<32x128xf32>
    %c0_52 = arith.constant 0 : index
    %c2_53 = arith.constant 2 : index
    %c0_54 = arith.constant 0 : index
    %65 = vector.load %arg11[%c0_52, %c2_53, %c0_54] : memref<2x18x128xf32, #tpu.memory_space<vmem>>, vector<2x16x128xf32>
    %66 = vector.shape_cast %65 : vector<2x16x128xf32> to vector<32x128xf32>
    %67 = tpu.concatenate %62, %64, %66 in 1 : vector<32x128xf32>, vector<32x128xf32>, vector<32x128xf32> -> vector<32x384xf32>
    %68 = arith.truncf %67 : vector<32x384xf32> to vector<32x384xbf16>
    %c0_55 = arith.constant 0 : index
    %c0_56 = arith.constant 0 : index
    %69 = vector.load %arg4[%c0_55, %c0_56] : memref<384x128xbf16, #tpu.memory_space<vmem>>, vector<384x128xbf16>
    %cst_57 = arith.constant dense<0.000000e+00> : vector<32x128xf32>
    %70 = tpu.matmul %68, %69, %cst_57 {dimension_numbers = #tpu.dot_dimension_numbers<[1], [0], [0], [1], [0, 0, 1, 1], [], []>} : vector<32x384xbf16>, vector<384x128xbf16>, vector<32x128xf32> -> vector<32x128xf32>
    %c0_58 = arith.constant 0 : index
    %c0_59 = arith.constant 0 : index
    %71 = vector.load %arg5[%c0_58, %c0_59] : memref<1x128xf32, #tpu.memory_space<vmem>>, vector<1x128xf32>
    %c0_60 = arith.constant 0 : index
    %c0_61 = arith.constant 0 : index
    %72 = vector.load %arg6[%c0_60, %c0_61] : memref<1x128xf32, #tpu.memory_space<vmem>>, vector<1x128xf32>
    %cst_62 = arith.constant dense<0.000000e+00> : vector<128xf32>
    %73 = vector.multi_reduction <add>, %70, %cst_62 [0] : vector<32x128xf32> to vector<128xf32>
    %74 = vector.shape_cast %73 : vector<128xf32> to vector<1x128xf32>
    %c64_i32_63 = arith.constant 64 : i32
    %75 = tpu.dynamic_rotate %74 by %c64_i32_63 dim 1 : vector<1x128xf32>, i32 -> vector<1x128xf32>
    %76 = arith.addf %74, %75 : vector<1x128xf32>
    %c32_i32_64 = arith.constant 32 : i32
    %77 = tpu.dynamic_rotate %76 by %c32_i32_64 dim 1 : vector<1x128xf32>, i32 -> vector<1x128xf32>
    %78 = arith.addf %76, %77 : vector<1x128xf32>
    %c16_i32_65 = arith.constant 16 : i32
    %79 = tpu.dynamic_rotate %78 by %c16_i32_65 dim 1 : vector<1x128xf32>, i32 -> vector<1x128xf32>
    %80 = arith.addf %78, %79 : vector<1x128xf32>
    %c8_i32_66 = arith.constant 8 : i32
    %81 = tpu.dynamic_rotate %80 by %c8_i32_66 dim 1 : vector<1x128xf32>, i32 -> vector<1x128xf32>
    %82 = arith.addf %80, %81 : vector<1x128xf32>
    %cst_67 = arith.constant 0.001953125 : f32
    %83 = vector.broadcast %cst_67 : f32 to vector<1x128xf32>
    %84 = arith.mulf %82, %83 : vector<1x128xf32>
    %85 = vector.broadcast %84 : vector<1x128xf32> to vector<32x128xf32>
    %86 = arith.subf %70, %85 : vector<32x128xf32>
    %87 = arith.mulf %86, %86 : vector<32x128xf32>
    %cst_68 = arith.constant dense<0.000000e+00> : vector<128xf32>
    %88 = vector.multi_reduction <add>, %87, %cst_68 [0] : vector<32x128xf32> to vector<128xf32>
    %89 = vector.shape_cast %88 : vector<128xf32> to vector<1x128xf32>
    %c64_i32_69 = arith.constant 64 : i32
    %90 = tpu.dynamic_rotate %89 by %c64_i32_69 dim 1 : vector<1x128xf32>, i32 -> vector<1x128xf32>
    %91 = arith.addf %89, %90 : vector<1x128xf32>
    %c32_i32_70 = arith.constant 32 : i32
    %92 = tpu.dynamic_rotate %91 by %c32_i32_70 dim 1 : vector<1x128xf32>, i32 -> vector<1x128xf32>
    %93 = arith.addf %91, %92 : vector<1x128xf32>
    %c16_i32_71 = arith.constant 16 : i32
    %94 = tpu.dynamic_rotate %93 by %c16_i32_71 dim 1 : vector<1x128xf32>, i32 -> vector<1x128xf32>
    %95 = arith.addf %93, %94 : vector<1x128xf32>
    %c8_i32_72 = arith.constant 8 : i32
    %96 = tpu.dynamic_rotate %95 by %c8_i32_72 dim 1 : vector<1x128xf32>, i32 -> vector<1x128xf32>
    %97 = arith.addf %95, %96 : vector<1x128xf32>
    %cst_73 = arith.constant 0.001953125 : f32
    %98 = vector.broadcast %cst_73 : f32 to vector<1x128xf32>
    %99 = arith.mulf %97, %98 : vector<1x128xf32>
    %cst_74 = arith.constant 9.99999974E-5 : f32
    %100 = vector.broadcast %cst_74 : f32 to vector<1x128xf32>
    %101 = arith.addf %99, %100 : vector<1x128xf32>
    %102 = math.rsqrt %101 : vector<1x128xf32>
    %103 = arith.mulf %71, %102 : vector<1x128xf32>
    %104 = vector.broadcast %103 : vector<1x128xf32> to vector<32x128xf32>
    %105 = arith.mulf %86, %104 : vector<32x128xf32>
    %106 = vector.broadcast %72 : vector<1x128xf32> to vector<32x128xf32>
    %107 = arith.addf %105, %106 : vector<32x128xf32>
    %cst_75 = arith.constant 0.000000e+00 : f32
    %108 = vector.broadcast %cst_75 : f32 to vector<32x128xf32>
    %109 = arith.maximumf %107, %108 : vector<32x128xf32>
    %110 = vector.shape_cast %109 : vector<32x128xf32> to vector<2x16x128xf32>
    %c0_76 = arith.constant 0 : index
    %c0_77 = arith.constant 0 : index
    %c0_78 = arith.constant 0 : index
    %111 = vector.load %arg8[%c0_76, %c0_77, %c0_78] : memref<2x16x128xf32, #tpu.memory_space<vmem>>, vector<2x16x128xf32>
    tpu.vector_store %arg8[%c0_76, %c0_77, %c0_78], %110 {strides = array<i32>} : memref<2x16x128xf32, #tpu.memory_space<vmem>>, vector<2x16x128xf32>,
    %112 = vector.shape_cast %109 : vector<32x128xf32> to vector<16x2x128xf32>
    %113 = vector.extract_strided_slice %112 {offsets = [0, 0, 0], sizes = [16, 1, 128], strides = [1, 1, 1]} : vector<16x2x128xf32> to vector<16x1x128xf32>
    %114 = vector.shape_cast %113 : vector<16x1x128xf32> to vector<16x128xf32>
    %115 = vector.extract_strided_slice %112 {offsets = [0, 1, 0], sizes = [16, 1, 128], strides = [1, 1, 1]} : vector<16x2x128xf32> to vector<16x1x128xf32>
    %116 = vector.shape_cast %115 : vector<16x1x128xf32> to vector<16x128xf32>
    %117 = arith.maximumf %114, %116 : vector<16x128xf32>
    %118 = vector.shape_cast %117 : vector<16x128xf32> to vector<8x256xf32>
    %c0_79 = arith.constant 0 : index
    %c0_80 = arith.constant 0 : index
    %119 = vector.load %arg7[%c0_79, %c0_80] : memref<256x256xf32, #tpu.memory_space<vmem>>, vector<256x256xf32>
    %cst_81 = arith.constant dense<0.000000e+00> : vector<8x256xf32>
    %120 = tpu.matmul %118, %119, %cst_81 {dimension_numbers = #tpu.dot_dimension_numbers<[1], [0], [0], [1], [0, 0, 1, 1], [], []>} : vector<8x256xf32>, vector<256x256xf32>, vector<8x256xf32> -> vector<8x256xf32>
    %121 = vector.extract_strided_slice %120 {offsets = [0, 0], sizes = [8, 128], strides = [1, 1]} : vector<8x256xf32> to vector<8x128xf32>
    %122 = vector.extract_strided_slice %120 {offsets = [0, 128], sizes = [8, 128], strides = [1, 1]} : vector<8x256xf32> to vector<8x128xf32>
    %123 = arith.maximumf %121, %122 : vector<8x128xf32>
    %124 = vector.shape_cast %123 : vector<8x128xf32> to vector<2x4x128xf32>
    %c0_82 = arith.constant 0 : index
    %c0_83 = arith.constant 0 : index
    %c0_84 = arith.constant 0 : index
    %125 = vector.load %arg9[%c0_82, %c0_83, %c0_84] : memref<2x4x128xf32, #tpu.memory_space<vmem>>, vector<2x4x128xf32>
    tpu.vector_store %arg9[%c0_82, %c0_83, %c0_84], %124 {strides = array<i32>} : memref<2x4x128xf32, #tpu.memory_space<vmem>>, vector<2x4x128xf32>,
    return
  }
}

</mosaic_0001>

<bundles_post_ra>
// kernel: stack_encoder_org_fwd.1
= control target key start
LH: loop header
LB: loop body
LE: loop exit
PB: predicated region body
PF: predicated region fallthrough
CT: control target
= control target key end

     0   :  { %15 = vsyncpa [#allocation5], 0  ;;  %s1424_s30 = smov [#allocation4]   ;;  %s1772_s0 = inlined_call_operand.vmem [shape: f32[2,16,64], index: 0, kind: input, shape index: {}]   ;;  %s1773_s1 = inlined_call_operand.vmem [shape: bf16[192,128], index: 1, kind: input, shape index: {}]   ;;  %s1774_s2 = inlined_call_operand.vmem [shape: f32[1,128], index: 2, kind: input, shape index: {}]   ;;  %s1775_s3 = inlined_call_operand.vmem [shape: f32[1,128], index: 3, kind: input, shape index: {}]   ;;  %s1776_s4 = inlined_call_operand.vmem [shape: bf16[384,128], index: 4, kind: input, shape index: {}]   ;;  %s1777_s5 = inlined_call_operand.vmem [shape: f32[1,128], index: 5, kind: input, shape index: {}]   ;;  %s1778_s6 = inlined_call_operand.vmem [shape: f32[1,128], index: 6, kind: input, shape index: {}]   ;;  %s1779_s7 = inlined_call_operand.hbm [shape: f32[256,256], index: 7, kind: input, shape index: {}]   ;;  %s1780_s8 = inlined_call_operand.vmem [shape: f32[2,16,128], index: 8, kind: output, shape index: {0}]   ;;  %s1781_s9 = inlined_call_operand.vmem [shape: f32[2,4,128], index: 9, kind: output, shape index: {1}]  }
   0x1   :  { %s35_s10 = sshll.u32 %s1424_s30, 4  ;;  %s1400_s13 = scalar_lea.hbm %s1779_s7, 8192  ;;  %s36_s10 = int_to_ptr.vmem [resolvable:$true] %s35_s10 }
   0x2   :  { %p1401_p0 = scmp.ne.s32.totalorder %s1779_s7, %s1400_s13  ;;  %p1404_p1 = scmp.lt.u32.totalorder %s1400_s13, %s1779_s7 }
   0x4   :  { %p1406_p2 = pnand %p1404_p1, %p1401_p0 }
   0x6   :  { %1409 = shalt.err (!%p1406_p2)
}
   0x7   :  { %s1410_s18 = scalar_lea.vmem %s36_s10, 8192  ;;  %p1415_p4 = scmp.lt.s32.totalorder %s36_s10, %s36_s10 }
   0x8   :  { %p1411_p3 = scmp.ne.s32.totalorder %s36_s10, %s1410_s18  ;;  %p1416_p5 = scmp.lt.s32.totalorder %s1410_s18, %s1410_s18 }
   0xa   :  { %p1417_p6 = por %p1416_p5, %p1415_p4 }
   0xc   :  { %p1418_p7 = pnand %p1417_p6, %p1411_p3 }
   0xe   :  { %1421 = shalt.err (!%p1418_p7)
}
   0xf   :  { %s1425_s19 = smov 256   ;;  %s1426_s20 = smov 16  }
  0x10   :  { %41 = dma.hbm_to_vmem [thread:$0]  %s1779_s7, 8192, %s36_s10, [#allocation5], %s1425_s19, %s1425_s19, %s1426_s20  }
  0x11   :  { %1422 = dma.done.wait [#allocation5], 8192  }
  0x12   :  { %1423 = vsyncadd [#allocation5], 4294959104  ;;  %vm46_vm0 = vcmask 516096   ;;  %v1427_v0 = vmov 0   ;;  %v1428_v1 = vmov 0.0   ;;  %vm55_vm1 = vcmask 523264  }
  0x13   :  { %198 = vmatprep.subr.bf16.mxu0 %v1427_v0  ;;  %49 = vst.msk [vmem:[#allocation2 + $0x11] sm:$0x1] %vm46_vm0, %v1428_v1  ;;  %47 = vst.msk [vmem:[#allocation2] sm:$0x1] %vm46_vm0, %v1428_v1  ;;  %v51_v2 = vld [vmem:[%s1772_s0] sm:$0xff]  ;;  %v52_v3 = vld [vmem:[%s1772_s0 + $0x8] sm:$0xff] }
  0x14   :  { %48 = vst.msk [vmem:[#allocation2 + $0x18] sm:$0x1] %vm46_vm0, %v1428_v1  ;;  %50 = vst.msk [vmem:[#allocation2 + $0x29] sm:$0x1] %vm46_vm0, %v1428_v1  ;;  %v53_v4 = vld [vmem:[%s1772_s0 + $0x10] sm:$0xff]  ;;  %v54_v5 = vld [vmem:[%s1772_s0 + $0x18] sm:$0xff] }
  0x15   :  { %332 = vst [vmem:[#allocation3] sm:$0x1] %v1428_v1  ;;  %333 = vst [vmem:[#allocation3 + $0x18] sm:$0x1] %v1428_v1  ;;  %v1360_v6 = vld [vmem:[%s1773_s1] sm:$0xff]   ;;  %v1361_v7 = vld [vmem:[%s1773_s1 + $0x8] sm:$0xff]  }
  0x16   :  { %334 = vst [vmem:[#allocation3 + $0x11] sm:$0x1] %v1428_v1  ;;  %335 = vst [vmem:[#allocation3 + $0x29] sm:$0x1] %v1428_v1  ;;  %199 = vmatpush1.bf16.msra.mxu0 %v1360_v6  ;;  %v1362_v8 = vld [vmem:[%s1773_s1 + $0x10] sm:$0xff]   ;;  %s1429_s0 = smov 64  }
  0x17   :  { %56 = vst.msk [vmem:[#allocation2 + $0x1] sm:$0xff] %vm55_vm1, %v51_v2  ;;  %57 = vst.msk [vmem:[#allocation2 + $0x9] sm:$0xff] %vm55_vm1, %v52_v3  ;;  %200 = vmatprep.subr.bf16.mxu0 %v1427_v0  ;;  %v1363_v15 = vld [vmem:[%s1773_s1 + $0x18] sm:$0xff]   ;;  %v1364_v18 = vld [vmem:[%s1773_s1 + $0x20] sm:$0xff]   ;;  %s1431_s12 = smov 8   ;;  %vm969_vm2 = vcmask 1041409  }
  0x18   :  { %58 = vst.msk [vmem:[#allocation2 + $0x19] sm:$0xff] %vm55_vm1, %v53_v4  ;;  %59 = vst.msk [vmem:[#allocation2 + $0x21] sm:$0xff] %vm55_vm1, %v54_v5  ;;  %v1365_v20 = vld [vmem:[%s1773_s1 + $0x28] sm:$0xff]   ;;  %v1366_v21 = vld [vmem:[%s1773_s1 + $0x30] sm:$0xff]   ;;  %v271_v5 = vlaneseq  ;;  %vm971_vm3 = vcmask 1042434   ;;  %vm973_vm4 = vcmask 1043459  }
  0x19   :  { %v1367_v22 = vld [vmem:[%s1773_s1 + $0x38] sm:$0xff]   ;;  %v1368_v23 = vld [vmem:[%s1773_s1 + $0x40] sm:$0xff]   ;;  %v1369_v24 = vld [vmem:[%s1773_s1 + $0x48] sm:$0xff]   ;;  %vm975_vm5 = vcmask 1044484   ;;  %vm977_vm6 = vcmask 1045509   ;;  %vm979_vm7 = vcmask 1046534  }
  0x1a   :  { %201 = vmatpush1.bf16.msra.mxu0 %v1361_v7  ;;  %v1370_v25 = vld [vmem:[%s1773_s1 + $0x50] sm:$0xff]   ;;  %v1371_v26 = vld [vmem:[%s1773_s1 + $0x58] sm:$0xff]   ;;  %s1430_s1 = smov 32   ;;  %v1573_v6 = vshrl.u32 %v271_v5, 7  ;;  %vm981_vm8 = vcmask 1047559  }
  0x1b   :  { %202 = vmatprep.subr.bf16.mxu0 %v1427_v0 }
  0x1e   :  { %v64_v9 = vld [vmem:[#allocation2 + $0x1] sm:$0xff]  ;;  %v65_v10 = vld [vmem:[#allocation2 + $0x9] sm:$0xff]  ;;  %203 = vmatpush1.bf16.msra.mxu0 %v1362_v8  ;;  %v1576_v8 = vsub.s32 0, %v1573_v6 }
  0x1f   :  { %v66_v11 = vld [vmem:[#allocation2 + $0x19] sm:$0xff]  ;;  %v1350_v12 = vpack.i.bf16 %v65_v10, %v64_v9  ;;  %v67_v13 = vld [vmem:[#allocation2 + $0x21] sm:$0xff]  ;;  %204 = vmatprep.subr.bf16.mxu0 %v1427_v0  ;;  %v69_v17 = vld [vmem:[#allocation2 + $0xa] sm:$0xff] }
  0x20   :  { %v1355_v14 = vpack.i.bf16 %v67_v13, %v66_v11  ;;  %v68_v16 = vld [vmem:[#allocation2 + $0x2] sm:$0xff]  ;;  %v70_v30 = vld [vmem:[#allocation2 + $0x1a] sm:$0xff] }
  0x21   :  { %1351 = vrot.lane.b32.xlu0 %v1350_v12, %s1429_s0  ;;  %v93_v19 = vpack.c.bf16 %v69_v17, %v68_v16  ;;  %v60_v27 = vld [vmem:[#allocation2] sm:$0xff]  ;;  %v61_v29 = vld [vmem:[#allocation2 + $0x8] sm:$0xff]  ;;  %v62_v39 = vld [vmem:[#allocation2 + $0x18] sm:$0xff] }
  0x22   :  { %205 = vmatpush1.bf16.msra.mxu0 %v1363_v15  ;;  %v71_v31 = vld [vmem:[#allocation2 + $0x22] sm:$0xff] }
  0x23   :  { %206 = vmatprep.subr.bf16.mxu0 %v1427_v0  ;;  %1174 = vmatprep.mubr.msk.bf16.mxu0 %vm55_vm1, %v93_v19  ;;  %v95_v36 = vpack.c.bf16 %v71_v31, %v70_v30  ;;  %v63_v40 = vld [vmem:[#allocation2 + $0x20] sm:$0xff] }
  0x25   :  { %1356 = vrot.lane.b32.xlu0 %v1355_v14, %s1429_s0 }
  0x26   :  { %207 = vmatpush1.bf16.msra.mxu0 %v1364_v18 }
  0x27   :  { %208 = vmatprep.subr.bf16.mxu0 %v1427_v0 }
  0x2a   :  { %209 = vmatpush1.bf16.msra.mxu0 %v1365_v20 }
  0x2b   :  { %210 = vmatprep.subr.bf16.mxu0 %v1427_v0 }
  0x2e   :  { %211 = vmatpush1.bf16.msra.mxu0 %v1366_v21 }
  0x2f   :  { %212 = vmatprep.subr.bf16.mxu0 %v1427_v0 }
  0x32   :  { %213 = vmatpush1.bf16.msra.mxu0 %v1367_v22 }
  0x33   :  { %214 = vmatprep.subr.bf16.mxu0 %v1427_v0 }
  0x36   :  { %215 = vmatpush1.bf16.msra.mxu0 %v1368_v23 }
  0x37   :  { %216 = vmatprep.subr.bf16.mxu0 %v1427_v0 }
  0x3a   :  { %217 = vmatpush1.bf16.msra.mxu0 %v1369_v24 }
  0x3b   :  { %218 = vmatprep.subr.bf16.mxu0 %v1427_v0 }
  0x3e   :  { %219 = vmatpush1.bf16.msra.mxu0 %v1370_v25 }
  0x3f   :  { %220 = vmatprep.subr.bf16.mxu0 %v1427_v0 }
  0x42   :  { %221 = vmatpush1.bf16.msra.mxu0 %v1371_v26 }
  0x93   :  { %v1352_v28 = vpop.permute.xlu0 %1351 }
  0x94   :  { %v1354_v32 = vunpack.i.h.bf16 %v1352_v28  ;;  %v1353_v33 = vunpack.i.l.bf16 %v1352_v28 }
  0x96   :  { %v88_v34 = vsel %vm55_vm1, %v60_v27, %v1353_v33  ;;  %v89_v35 = vsel %vm55_vm1, %v61_v29, %v1354_v32  ;;  %v1372_v33 = vld [vmem:[%s1776_s4 + $0x40] sm:$0xff]  }
  0x97   :  { %v92_v37 = vpack.c.bf16 %v89_v35, %v88_v34  ;;  %v1357_v38 = vpop.permute.xlu0 %1356  ;;  %v1373_v34 = vld [vmem:[%s1776_s4] sm:$0xff]   ;;  %1218 = vmatprep.subr.bf16.mxu1 %v1372_v33  ;;  %v1374_v35 = vld [vmem:[%s1776_s4 + $0x48] sm:$0xff]  }
  0x98   :  { %v1359_v41 = vunpack.i.h.bf16 %v1357_v38  ;;  %v1358_v42 = vunpack.i.l.bf16 %v1357_v38  ;;  %1219 = vmatpush3.bf16.msra.mxu1 %v1373_v34  ;;  %v1376_v38 = vld [vmem:[%s1776_s4 + $0x50] sm:$0xff]  }
  0x99   :  { %231 = vmatmul.mubr.bf16.vlgmr.msra.gmra.mrb[0].mxu0 %v92_v37  ;;  %1220 = vmatprep.subr.bf16.mxu1 %v1374_v35 }
  0x9a   :  { %1175 = vmatprep.mubr.msk.bf16.mxu0 %vm55_vm1, %v95_v36  ;;  %v90_v43 = vsel %vm55_vm1, %v62_v39, %v1358_v42  ;;  %v91_v44 = vsel %vm55_vm1, %v63_v40, %v1359_v41  ;;  %v1375_v36 = vld [vmem:[%s1776_s4 + $0x8] sm:$0xff]   ;;  %v1377_v40 = vld [vmem:[%s1776_s4 + $0x10] sm:$0xff]   ;;  %v1378_v41 = vld [vmem:[%s1776_s4 + $0x58] sm:$0xff]  }
  0x9b   :  { %v94_v45 = vpack.c.bf16 %v91_v44, %v90_v43  ;;  %v1379_v42 = vld [vmem:[%s1776_s4 + $0x18] sm:$0xff]   ;;  %v1380_v43 = vld [vmem:[%s1776_s4 + $0x60] sm:$0xff]  }
  0x9c   :  { %1221 = vmatpush3.bf16.msra.mxu1 %v1375_v36  ;;  %v1381_v44 = vld [vmem:[%s1776_s4 + $0x20] sm:$0xff]  }
  0x9d   :  { %1222 = vmatprep.subr.bf16.mxu1 %v1376_v38 }
  0xa0   :  { %1223 = vmatpush3.bf16.msra.mxu1 %v1377_v40 }
  0xa1   :  { %239 = vmatmul.mubr.bf16.gmra.mrb[4].mxu0 %v94_v45  ;;  %1224 = vmatprep.subr.bf16.mxu1 %v1378_v41  ;;  %v1382_v45 = vld [vmem:[%s1776_s4 + $0x68] sm:$0xff]  }
  0xa4   :  { %1225 = vmatpush3.bf16.msra.mxu1 %v1379_v42 }
  0xa5   :  { %1226 = vmatprep.subr.bf16.mxu1 %v1380_v43 }
  0xa8   :  { %1227 = vmatpush3.bf16.msra.mxu1 %v1381_v44 }
  0xa9   :  { %1228 = vmatprep.subr.bf16.mxu1 %v1382_v45 }
 0x16c   :  { %v232_v46 = vpop.f32.mrb[0].mxu0 }
 0x16d   :  { %v234_v47 = vpop.f32.mrb[1].mxu0 }
 0x16e   :  { %v235_v48 = vpop.f32.mrb[2].mxu0  ;;  %v1384_v47 = vld [vmem:[%s1776_s4 + $0x70] sm:$0xff]  }
 0x16f   :  { %v249_v49 = vadd.f32 %v235_v48, %v232_v46  ;;  %v237_v50 = vpop.f32.mrb[3].mxu0 }
 0x170   :  { %v1387_v50 = vld [vmem:[%s1776_s4 + $0x38] sm:$0xff]  }
 0x174   :  { %v240_v51 = vpop.f32.mrb[4].mxu0 }
 0x175   :  { %v250_v52 = vadd.f32 %v249_v49, %v240_v51  ;;  %v242_v53 = vpop.f32.mrb[5].mxu0  ;;  %v1386_v49 = vld [vmem:[%s1776_s4 + $0x78] sm:$0xff]  }
 0x176   :  { %v243_v54 = vpop.f32.mrb[6].mxu0 }
 0x177   :  { %v251_v55 = vadd.f32 %v250_v52, %v243_v54  ;;  %v245_v56 = vpop.f32.mrb[7].mxu0 }
 0x178   :  { %v247_v56 = vld [vmem:[%s1774_s2] sm:$0x1] }
 0x179   :  { %v252_v57 = vrot.slane %v251_v55, 4 }
 0x17b   :  { %v253_v58 = vadd.f32 %v252_v57, %v251_v55 }
 0x17d   :  { %v254_v59 = vrot.slane %v253_v58, 2 }
 0x17f   :  { %v255_v60 = vadd.f32 %v254_v59, %v253_v58 }
 0x181   :  { %v256_v61 = vrot.slane %v255_v60, 1 }
 0x183   :  { %v257_v62 = vadd.f32 %v256_v61, %v255_v60  ;;  %v1176_v60 = vld [vmem:[%s1775_s3] ss:$0 sm:$0xff] }
 0x185   :  { %258 = vrot.lane.b32.xlu1 %v257_v62, %s1429_s0 }
 0x1f7   :  { %v259_v63 = vpop.permute.xlu1 %258 }
 0x1f8   :  { %v260_v0 = vadd.f32 %v259_v63, %v257_v62 }
 0x1fa   :  { %261 = vrot.lane.b32.xlu1 %v260_v0, %s1430_s1 }
 0x26c   :  { %v262_v1 = vpop.permute.xlu1 %261 }
 0x26d   :  { %v263_v2 = vadd.f32 %v262_v1, %v260_v0 }
 0x26f   :  { %264 = vrot.lane.b32.xlu0 %v263_v2, %s1426_s20 }
 0x2e1   :  { %v265_v3 = vpop.permute.xlu0 %264 }
 0x2e2   :  { %v266_v4 = vadd.f32 %v265_v3, %v263_v2 }
 0x2e4   :  { %267 = vrot.lane.b32.xlu1 %v266_v4, %s1431_s12 }
 0x356   :  { %v268_v7 = vpop.permute.xlu1 %267 }
 0x357   :  { %v269_v9 = vadd.f32 %v268_v7, %v266_v4 }
 0x359   :  { %v270_v10 = vmul.f32 0.001953125, %v269_v9 }
 0x35b   :  { %v274_v11 = vrot.slane %v270_v10, %v1576_v8 }
 0x35d   :  { %v1579_v12 = vsub.f32 %v232_v46, %v274_v11  ;;  %v1581_v13 = vsub.f32 %v235_v48, %v274_v11  ;;  %v1583_v14 = vsub.f32 %v240_v51, %v274_v11  ;;  %v1585_v15 = vsub.f32 %v243_v54, %v274_v11  ;;  %v1383_v46 = vld [vmem:[%s1776_s4 + $0x28] sm:$0xff]   ;;  %v1385_v48 = vld [vmem:[%s1776_s4 + $0x30] sm:$0xff]   ;;  %v1388_v51 = vld [vmem:[%s1776_s4 + $0x80] sm:$0xff]  }
 0x35e   :  { %1229 = vmatpush3.bf16.msra.mxu1 %v1383_v46 }
 0x35f   :  { %v279_v16 = vmul.f32 %v1579_v12, %v1579_v12  ;;  %v280_v17 = vmul.f32 %v1581_v13, %v1581_v13  ;;  %v281_v18 = vmul.f32 %v1583_v14, %v1583_v14  ;;  %v282_v20 = vmul.f32 %v1585_v15, %v1585_v15  ;;  %1230 = vmatprep.subr.bf16.mxu1 %v1384_v47 }
 0x361   :  { %v283_v19 = vadd.f32 %v280_v17, %v279_v16  ;;  %v1390_v17 = vld [vmem:[%s1776_s4 + $0x90] sm:$0xff]  }
 0x362   :  { %1231 = vmatpush3.bf16.msra.mxu1 %v1385_v48 }
 0x363   :  { %v284_v21 = vadd.f32 %v283_v19, %v281_v18  ;;  %1232 = vmatprep.subr.bf16.mxu1 %v1386_v49 }
 0x365   :  { %v285_v22 = vadd.f32 %v284_v21, %v282_v20 }
 0x366   :  { %1233 = vmatpush3.bf16.msra.mxu1 %v1387_v50 }
 0x367   :  { %v286_v23 = vrot.slane %v285_v22, 4  ;;  %1256 = vmatprep.subr.bf16.mxu1 %v1388_v51 }
 0x369   :  { %v287_v24 = vadd.f32 %v286_v23, %v285_v22  ;;  %v1391_v23 = vld [vmem:[%s1776_s4 + $0x98] sm:$0xff]  }
 0x36b   :  { %v288_v25 = vrot.slane %v287_v24, 2 }
 0x36d   :  { %v289_v26 = vadd.f32 %v288_v25, %v287_v24  ;;  %v1392_v25 = vld [vmem:[%s1776_s4 + $0xa0] sm:$0xff]  }
 0x36f   :  { %v290_v27 = vrot.slane %v289_v26, 1 }
 0x371   :  { %v291_v28 = vadd.f32 %v290_v27, %v289_v26  ;;  %v1393_v26 = vld [vmem:[%s1776_s4 + $0xa8] sm:$0xff]   ;;  %v1394_v27 = vld [vmem:[%s1776_s4 + $0xb0] sm:$0xff]  }
 0x373   :  { %292 = vrot.lane.b32.xlu0 %v291_v28, %s1429_s0 }
 0x3e5   :  { %v293_v29 = vpop.permute.xlu0 %292 }
 0x3e6   :  { %v294_v30 = vadd.f32 %v293_v29, %v291_v28  ;;  %v1395_v28 = vld [vmem:[%s1776_s4 + $0xb8] sm:$0xff]  }
 0x3e8   :  { %295 = vrot.lane.b32.xlu1 %v294_v30, %s1430_s1 }
 0x45a   :  { %v296_v31 = vpop.permute.xlu1 %295 }
 0x45b   :  { %v297_v32 = vadd.f32 %v296_v31, %v294_v30 }
 0x45d   :  { %298 = vrot.lane.b32.xlu0 %v297_v32, %s1426_s20 }
 0x4cf   :  { %v299_v37 = vpop.permute.xlu0 %298 }
 0x4d0   :  { %v300_v39 = vadd.f32 %v299_v37, %v297_v32 }
 0x4d2   :  { %301 = vrot.lane.b32.xlu1 %v300_v39, %s1431_s12 }
 0x544   :  { %v302_v52 = vpop.permute.xlu1 %301 }
 0x545   :  { %v303_v53 = vadd.f32 %v302_v52, %v300_v39 }
 0x547   :  { %v304_v54 = vmul.f32 0.001953125, %v303_v53 }
 0x549   :  { %v305_v55 = vadd.f32 0.0001, %v304_v54 }
 0x54b   :  { %1396 = vrsqrt.f32 %v305_v55 }
 0x555   :  { %v1397_v57 = vpop.eup %1396 }
 0x556   :  { %v307_v58 = vmul.f32 %v1397_v57, %v247_v56 }
 0x558   :  { %v312_v59 = vrot.slane %v307_v58, %v1576_v8 }
 0x55a   :  { %v314_v61 = vmul.f32 %v312_v59, %v1579_v12  ;;  %v315_v62 = vmul.f32 %v312_v59, %v1581_v13  ;;  %v316_v63 = vmul.f32 %v312_v59, %v1583_v14  ;;  %v317_v0 = vmul.f32 %v312_v59, %v1585_v15  ;;  %v1389_v14 = vld [vmem:[%s1776_s4 + $0x88] sm:$0xff]  }
 0x55c   :  { %v324_v1 = vadd.f32 %v1176_v60, %v314_v61  ;;  %v325_v2 = vadd.f32 %v1176_v60, %v315_v62  ;;  %v326_v3 = vadd.f32 %v1176_v60, %v316_v63  ;;  %v327_v4 = vadd.f32 %v1176_v60, %v317_v0 }
 0x55e   :  { %v328_v5 = vmax.f32 %v324_v1, 0.0  ;;  %v329_v7 = vmax.f32 %v325_v2, 0.0  ;;  %v330_v9 = vmax.f32 %v326_v3, 0.0  ;;  %v331_v10 = vmax.f32 %v327_v4, 0.0 }
 0x560   :  { %336 = vst [vmem:[#allocation3 + $0x1] sm:$0xff] %v328_v5  ;;  %337 = vst [vmem:[#allocation3 + $0x9] sm:$0xff] %v329_v7  ;;  %v353_v11 = vpack.c.bf16 %v329_v7, %v328_v5  ;;  %v356_v15 = vpack.c.bf16 %v331_v10, %v330_v9 }
 0x561   :  { %338 = vst [vmem:[#allocation3 + $0x19] sm:$0xff] %v330_v9  ;;  %339 = vst [vmem:[#allocation3 + $0x21] sm:$0xff] %v331_v10 }
 0x562   :  { %582 = vmatprep.mubr.bf16.mxu1 %v353_v11 }
 0x567   :  { %v340_v12 = vld [vmem:[#allocation3] sm:$0xff]  ;;  %v341_v13 = vld [vmem:[#allocation3 + $0x8] sm:$0xff] }
 0x568   :  { %v352_v16 = vpack.c.bf16 %v341_v13, %v340_v12  ;;  %v342_v18 = vld [vmem:[#allocation3 + $0x18] sm:$0xff]  ;;  %v343_v19 = vld [vmem:[#allocation3 + $0x20] sm:$0xff]  ;;  %v349_v21 = vld [vmem:[#allocation3 + $0xa] sm:$0xff] }
 0x569   :  { %v348_v20 = vld [vmem:[#allocation3 + $0x2] sm:$0xff]  ;;  %v355_v22 = vpack.c.bf16 %v343_v19, %v342_v18  ;;  %v350_v29 = vld [vmem:[#allocation3 + $0x1a] sm:$0xff] }
 0x56a   :  { %583 = vmatmul.mubr.bf16.vlgmr.msra.gmra.mrb[0].mxu1 %v352_v16  ;;  %v354_v24 = vpack.c.bf16 %v349_v21, %v348_v20  ;;  %v351_v30 = vld [vmem:[#allocation3 + $0x22] sm:$0xff] }
 0x56b   :  { %1257 = vmatpush3.bf16.msra.mxu1 %v1388_v51  ;;  %590 = vmatprep.mubr.bf16.mxu1 %v356_v15  ;;  %v357_v31 = vpack.c.bf16 %v351_v30, %v350_v29  ;;  %v1009_v29 = vld [vmem:[#allocation4 + $0x18] sm:$0xff]  ;;  %v1006_v30 = vld [vmem:[#allocation4] sm:$0xff] }
 0x56c   :  { %1258 = vmatprep.subr.bf16.mxu1 %v1389_v14 }
 0x56f   :  { %1259 = vmatpush3.bf16.msra.mxu1 %v1389_v14 }
 0x570   :  { %1260 = vmatprep.subr.bf16.mxu1 %v1390_v17 }
 0x572   :  { %591 = vmatmul.mubr.bf16.gmra.mrb[4].mxu1 %v355_v22 }
 0x573   :  { %1261 = vmatpush3.bf16.msra.mxu1 %v1390_v17  ;;  %1272 = vmatprep.mubr.bf16.mxu1 %v354_v24 }
 0x574   :  { %1262 = vmatprep.subr.bf16.mxu1 %v1391_v23 }
 0x577   :  { %1263 = vmatpush3.bf16.msra.mxu1 %v1391_v23 }
 0x578   :  { %1264 = vmatprep.subr.bf16.mxu1 %v1392_v25 }
 0x57b   :  { %1265 = vmatpush3.bf16.msra.mxu1 %v1392_v25 }
 0x57c   :  { %1266 = vmatprep.subr.bf16.mxu1 %v1393_v26 }
 0x57f   :  { %1267 = vmatpush3.bf16.msra.mxu1 %v1393_v26 }
 0x580   :  { %1268 = vmatprep.subr.bf16.mxu1 %v1394_v27 }
 0x583   :  { %1269 = vmatpush3.bf16.msra.mxu1 %v1394_v27 }
 0x584   :  { %1270 = vmatprep.subr.bf16.mxu1 %v1395_v28 }
 0x587   :  { %1271 = vmatpush3.bf16.msra.mxu1 %v1395_v28  ;;  %v1007_v28 = vld [vmem:[#allocation4 + $0x8] sm:$0xff] }
 0x58a   :  { %1273 = vmatmul.mubr.bf16.vlgmr.msra.gmra.mrb[8].mxu1 %v357_v31  ;;  %v1276_v31 = vpack.c.bf16 %v1009_v29, %v1007_v28  ;;  %v1043_v28 = vld [vmem:[#allocation4 + $0x128] sm:$0xff]  ;;  %v1045_v29 = vld [vmem:[#allocation4 + $0x138] sm:$0xff] }
 0x58c   :  { %1277 = vmatprep.subr.bf16.mxu0 %v1276_v31  ;;  %v1042_v31 = vld [vmem:[#allocation4 + $0x120] sm:$0xff] }
 0x63d   :  { %v1234_v32 = vpop.f32.mrb[0].mxu1 }
 0x63e   :  { %v1235_v33 = vpop.f32.mrb[1].mxu1 }
 0x63f   :  { %v1236_v34 = vadd.f32 %v1235_v33, %v1234_v32  ;;  %v1237_v35 = vpop.f32.mrb[2].mxu1  ;;  %v1008_v32 = vld [vmem:[#allocation4 + $0x10] sm:$0xff]  ;;  %v1011_v33 = vld [vmem:[#allocation4 + $0x28] sm:$0xff] }
 0x640   :  { %v1238_v36 = vpop.f32.mrb[3].mxu1 }
 0x641   :  { %v1239_v37 = vadd.f32 %v1238_v36, %v1237_v35  ;;  %v1278_v35 = vpack.c.bf16 %v1008_v32, %v1006_v30  ;;  %v1312_v30 = vpack.c.bf16 %v1045_v29, %v1043_v28  ;;  %v1044_v32 = vld [vmem:[#allocation4 + $0x130] sm:$0xff] }
 0x643   :  { %1279 = vmatpush1.bf16.msra.mxu0 %v1278_v35  ;;  %v1049_v35 = vld [vmem:[#allocation4 + $0x158] sm:$0xff] }
 0x645   :  { %v1240_v38 = vpop.f32.mrb[4].mxu1 }
 0x646   :  { %v1241_v39 = vpop.f32.mrb[5].mxu1 }
 0x647   :  { %v1242_v40 = vadd.f32 %v1241_v39, %v1240_v38  ;;  %v1243_v41 = vpop.f32.mrb[6].mxu1  ;;  %v1012_v38 = vld [vmem:[#allocation4 + $0x30] sm:$0xff]  ;;  %v1015_v39 = vld [vmem:[#allocation4 + $0x48] sm:$0xff] }
 0x648   :  { %v1244_v42 = vpop.f32.mrb[7].mxu1 }
 0x649   :  { %v1245_v43 = vadd.f32 %v1244_v42, %v1243_v41 }
 0x65d   :  { %v1274_v44 = vpop.f32.mrb[8].mxu1 }
 0x65e   :  { %v642_v45 = vadd.f32 %v1274_v44, %v1242_v40  ;;  %v633_v46 = vpop.f32.mrb[9].mxu1  ;;  %v1017_v40 = vld [vmem:[#allocation4 + $0x58] sm:$0xff]  ;;  %v1016_v44 = vld [vmem:[#allocation4 + $0x50] sm:$0xff] }
 0x65f   :  { %v634_v47 = vadd.f32 %v1236_v34, %v633_v46  ;;  %v1275_v48 = vpop.f32.mrb[10].mxu1  ;;  %v1013_v34 = vld [vmem:[#allocation4 + $0x38] sm:$0xff]  ;;  %v1284_v42 = vpack.c.bf16 %v1017_v40, %v1015_v39  ;;  %v1051_v40 = vld [vmem:[#allocation4 + $0x168] sm:$0xff] }
 0x660   :  { %v645_v49 = vadd.f32 %v1275_v48, %v1245_v43  ;;  %v636_v50 = vpop.f32.mrb[11].mxu1  ;;  %v1280_v36 = vpack.c.bf16 %v1013_v34, %v1011_v33  ;;  %v1014_v43 = vld [vmem:[#allocation4 + $0x40] sm:$0xff]  ;;  %v1021_v46 = vld [vmem:[#allocation4 + $0x78] sm:$0xff]  ;;  %v1314_v33 = vpack.c.bf16 %v1044_v32, %v1042_v31  ;;  %v1047_v34 = vld [vmem:[#allocation4 + $0x148] sm:$0xff] }
 0x661   :  { %v637_v51 = vadd.f32 %v1239_v37, %v636_v50  ;;  %v1010_v37 = vld [vmem:[#allocation4 + $0x20] sm:$0xff]  ;;  %v1286_v48 = vpack.c.bf16 %v1016_v44, %v1014_v43  ;;  %v1052_v44 = vld [vmem:[#allocation4 + $0x170] sm:$0xff] }
 0x662   :  { %v1282_v41 = vpack.c.bf16 %v1012_v38, %v1010_v37  ;;  %1281 = vmatprep.subr.bf16.mxu0 %v1280_v36  ;;  %v1316_v36 = vpack.c.bf16 %v1049_v35, %v1047_v34  ;;  %v1046_v37 = vld [vmem:[#allocation4 + $0x140] sm:$0xff]  ;;  %v1048_v38 = vld [vmem:[#allocation4 + $0x150] sm:$0xff] }
 0x663   :  { %v650_v52 = vadd.f32 %v637_v51, %v634_v47  ;;  %v1318_v39 = vpack.c.bf16 %v1048_v38, %v1046_v37 }
 0x664   :  { %1283 = vmatpush1.bf16.msra.mxu0 %v1282_v41  ;;  %v1053_v41 = vld [vmem:[#allocation4 + $0x178] sm:$0xff] }
 0x665   :  { %v651_v53 = vadd.f32 %v650_v52, %v642_v45  ;;  %1285 = vmatprep.subr.bf16.mxu0 %v1284_v42  ;;  %v1020_v52 = vld [vmem:[#allocation4 + $0x70] sm:$0xff]  ;;  %v1050_v42 = vld [vmem:[#allocation4 + $0x160] sm:$0xff]  ;;  %v1320_v43 = vpack.c.bf16 %v1053_v41, %v1051_v40 }
 0x667   :  { %v652_v54 = vadd.f32 %v651_v53, %v645_v49 }
 0x668   :  { %1287 = vmatpush1.bf16.msra.mxu0 %v1286_v48 }
 0x669   :  { %v653_v55 = vrot.slane %v652_v54, 4 }
 0x66b   :  { %v654_v56 = vadd.f32 %v653_v55, %v652_v54  ;;  %v1023_v54 = vld [vmem:[#allocation4 + $0x88] sm:$0xff]  ;;  %v1025_v55 = vld [vmem:[#allocation4 + $0x98] sm:$0xff] }
 0x66d   :  { %v655_v57 = vrot.slane %v654_v56, 2 }
 0x66f   :  { %v656_v58 = vadd.f32 %v655_v57, %v654_v56  ;;  %v1292_v56 = vpack.c.bf16 %v1025_v55, %v1023_v54  ;;  %v1022_v57 = vld [vmem:[#allocation4 + $0x80] sm:$0xff] }
 0x670   :  { %v1058_v55 = vld [vmem:[#allocation4 + $0x1a0] sm:$0xff] }
 0x671   :  { %v657_v59 = vrot.slane %v656_v58, 1 }
 0x673   :  { %v658_v60 = vadd.f32 %v657_v59, %v656_v58  ;;  %v1024_v58 = vld [vmem:[#allocation4 + $0x90] sm:$0xff] }
 0x674   :  { %v1294_v59 = vpack.c.bf16 %v1024_v58, %v1022_v57  ;;  %v1063_v57 = vld [vmem:[#allocation4 + $0x1c8] sm:$0xff]  ;;  %v1065_v58 = vld [vmem:[#allocation4 + $0x1d8] sm:$0xff] }
 0x675   :  { %659 = vrot.lane.b32.xlu0 %v658_v60, %s1429_s0 }
 0x6e7   :  { %v660_v61 = vpop.permute.xlu0 %659 }
 0x6e8   :  { %v661_v62 = vadd.f32 %v660_v61, %v658_v60  ;;  %v1027_v60 = vld [vmem:[#allocation4 + $0xa8] sm:$0xff]  ;;  %v1029_v61 = vld [vmem:[#allocation4 + $0xb8] sm:$0xff] }
 0x6ea   :  { %662 = vrot.lane.b32.xlu1 %v661_v62, %s1430_s1 }
 0x75c   :  { %v663_v63 = vpop.permute.xlu1 %662 }
 0x75d   :  { %v664_v0 = vadd.f32 %v663_v63, %v661_v62  ;;  %v1296_v62 = vpack.c.bf16 %v1029_v61, %v1027_v60  ;;  %v1026_v63 = vld [vmem:[#allocation4 + $0xa0] sm:$0xff]  ;;  %v1332_v60 = vpack.c.bf16 %v1065_v58, %v1063_v57 }
 0x75e   :  { %v1062_v61 = vld [vmem:[#allocation4 + $0x1c0] sm:$0xff] }
 0x75f   :  { %665 = vrot.lane.b32.xlu0 %v664_v0, %s1426_s20 }
 0x7d1   :  { %v666_v1 = vpop.permute.xlu0 %665 }
 0x7d2   :  { %v667_v2 = vadd.f32 %v666_v1, %v664_v0  ;;  %v1028_v0 = vld [vmem:[#allocation4 + $0xb0] sm:$0xff] }
 0x7d3   :  { %v1298_v1 = vpack.c.bf16 %v1028_v0, %v1026_v63  ;;  %v1067_v63 = vld [vmem:[#allocation4 + $0x1e8] sm:$0xff]  ;;  %v1069_v0 = vld [vmem:[#allocation4 + $0x1f8] sm:$0xff] }
 0x7d4   :  { %668 = vrot.lane.b32.xlu1 %v667_v2, %s1431_s12 }
 0x846   :  { %v669_v3 = vpop.permute.xlu1 %668 }
 0x847   :  { %v670_v4 = vadd.f32 %v669_v3, %v667_v2  ;;  %v1031_v2 = vld [vmem:[#allocation4 + $0xc8] sm:$0xff]  ;;  %v1033_v3 = vld [vmem:[#allocation4 + $0xd8] sm:$0xff] }
 0x849   :  { %v671_v5 = vmul.f32 0.001953125, %v670_v4  ;;  %v1300_v4 = vpack.c.bf16 %v1033_v3, %v1031_v2  ;;  %v1336_v2 = vpack.c.bf16 %v1069_v0, %v1067_v63  ;;  %v1066_v3 = vld [vmem:[#allocation4 + $0x1e0] sm:$0xff] }
 0x84b   :  { %v675_v7 = vrot.slane %v671_v5, %v1576_v8  ;;  %v1030_v5 = vld [vmem:[#allocation4 + $0xc0] sm:$0xff] }
 0x84d   :  { %v1687_v9 = vsub.f32 %v634_v47, %v675_v7  ;;  %v1689_v10 = vsub.f32 %v637_v51, %v675_v7  ;;  %v1691_v11 = vsub.f32 %v642_v45, %v675_v7  ;;  %v1693_v12 = vsub.f32 %v645_v49, %v675_v7  ;;  %v1019_v45 = vld [vmem:[#allocation4 + $0x68] sm:$0xff]  ;;  %v1018_v51 = vld [vmem:[#allocation4 + $0x60] sm:$0xff]  ;;  %v1032_v7 = vld [vmem:[#allocation4 + $0xd0] sm:$0xff] }
 0x84e   :  { %v1288_v50 = vpack.c.bf16 %v1021_v46, %v1019_v45  ;;  %v1290_v53 = vpack.c.bf16 %v1020_v52, %v1018_v51  ;;  %v1055_v45 = vld [vmem:[#allocation4 + $0x188] sm:$0xff]  ;;  %v1057_v46 = vld [vmem:[#allocation4 + $0x198] sm:$0xff] }
 0x84f   :  { %v680_v13 = vmul.f32 %v1687_v9, %v1687_v9  ;;  %v681_v16 = vmul.f32 %v1689_v10, %v1689_v10  ;;  %v682_v14 = vmul.f32 %v1691_v11, %v1691_v11  ;;  %v683_v17 = vmul.f32 %v1693_v12, %v1693_v12  ;;  %v1059_v51 = vld [vmem:[#allocation4 + $0x1a8] sm:$0xff]  ;;  %v1061_v52 = vld [vmem:[#allocation4 + $0x1b8] sm:$0xff] }
 0x850   :  { %1289 = vmatprep.subr.bf16.mxu0 %v1288_v50  ;;  %v1324_v48 = vpack.c.bf16 %v1057_v46, %v1055_v45  ;;  %v1056_v50 = vld [vmem:[#allocation4 + $0x190] sm:$0xff]  ;;  %v1328_v54 = vpack.c.bf16 %v1061_v52, %v1059_v51  ;;  %v1433_v45 = vmov 1966171168  }
 0x851   :  { %v684_v15 = vadd.f32 %v681_v16, %v680_v13  ;;  %1291 = vmatpush1.bf16.msra.mxu0 %v1290_v53  ;;  %v1302_v13 = vpack.c.bf16 %v1032_v7, %v1030_v5  ;;  %v993_v46 = vunpack.c.l.s4 %v1433_v45 }
 0x852   :  { %1293 = vmatprep.subr.bf16.mxu0 %v1292_v56  ;;  %v1060_v56 = vld [vmem:[#allocation4 + $0x1b0] sm:$0xff] }
 0x853   :  { %v685_v18 = vadd.f32 %v684_v15, %v682_v14  ;;  %v1035_v15 = vld [vmem:[#allocation4 + $0xe8] sm:$0xff]  ;;  %v994_v63 = vunpack.c.0.s8 %v993_v46 }
 0x855   :  { %v686_v19 = vadd.f32 %v685_v18, %v683_v17  ;;  %1295 = vmatpush1.bf16.msra.mxu0 %v1294_v59  ;;  %v1037_v17 = vld [vmem:[#allocation4 + $0xf8] sm:$0xff]  ;;  %v1330_v59 = vpack.c.bf16 %v1060_v56, %v1058_v55 }
 0x856   :  { %1297 = vmatprep.subr.bf16.mxu0 %v1296_v62  ;;  %v1304_v18 = vpack.c.bf16 %v1037_v17, %v1035_v15  ;;  %v1064_v62 = vld [vmem:[#allocation4 + $0x1d0] sm:$0xff]  ;;  %v648_v17 = vld [vmem:[%s1777_s5] sm:$0x1] }
 0x857   :  { %v687_v20 = vrot.slane %v686_v19, 4 }
 0x859   :  { %v688_v21 = vadd.f32 %v687_v20, %v686_v19  ;;  %1299 = vmatpush1.bf16.msra.mxu0 %v1298_v1  ;;  %v1034_v19 = vld [vmem:[#allocation4 + $0xe0] sm:$0xff]  ;;  %v1036_v20 = vld [vmem:[#allocation4 + $0xf0] sm:$0xff]  ;;  %v1334_v1 = vpack.c.bf16 %v1064_v62, %v1062_v61 }
 0x85a   :  { %1301 = vmatprep.subr.bf16.mxu0 %v1300_v4  ;;  %v1068_v4 = vld [vmem:[#allocation4 + $0x1f0] sm:$0xff] }
 0x85b   :  { %v689_v22 = vrot.slane %v688_v21, 2  ;;  %v1338_v5 = vpack.c.bf16 %v1068_v4, %v1066_v3 }
 0x85d   :  { %v690_v23 = vadd.f32 %v689_v22, %v688_v21  ;;  %1303 = vmatpush1.bf16.msra.mxu0 %v1302_v13  ;;  %v1306_v21 = vpack.c.bf16 %v1036_v20, %v1034_v19  ;;  %v1039_v22 = vld [vmem:[#allocation4 + $0x108] sm:$0xff] }
 0x85e   :  { %1305 = vmatprep.subr.bf16.mxu0 %v1304_v18  ;;  %v1432_v18 = vmov 1983009808  }
 0x85f   :  { %v691_v24 = vrot.slane %v690_v23, 1  ;;  %v743_v19 = vunpack.c.l.s4 %v1432_v18 }
 0x861   :  { %v692_v25 = vadd.f32 %v691_v24, %v690_v23  ;;  %1307 = vmatpush1.bf16.msra.mxu0 %v1306_v21  ;;  %v1041_v23 = vld [vmem:[#allocation4 + $0x118] sm:$0xff] }
 0x862   :  { %v1308_v24 = vpack.c.bf16 %v1041_v23, %v1039_v22  ;;  %v744_v22 = vunpack.c.0.s8 %v743_v19 }
 0x863   :  { %693 = vrot.lane.b32.xlu0 %v692_v25, %s1429_s0 }
 0x864   :  { %1309 = vmatprep.subr.bf16.mxu0 %v1308_v24  ;;  %v1201_v24 = vld [vmem:[%s1778_s6] ss:$0 sm:$0xff]  ;;  %v747_v28 = vsub.s32 %v744_v22, %v1573_v6 }
 0x8d5   :  { %v694_v26 = vpop.permute.xlu0 %693 }
 0x8d6   :  { %v695_v27 = vadd.f32 %v694_v26, %v692_v25  ;;  %v1038_v25 = vld [vmem:[#allocation4 + $0x100] sm:$0xff]  ;;  %v1040_v26 = vld [vmem:[#allocation4 + $0x110] sm:$0xff] }
 0x8d8   :  { %696 = vrot.lane.b32.xlu1 %v695_v27, %s1430_s1 }
 0x94a   :  { %v697_v47 = vpop.permute.xlu1 %696 }
 0x94b   :  { %v698_v49 = vadd.f32 %v697_v47, %v695_v27  ;;  %v1310_v27 = vpack.c.bf16 %v1040_v26, %v1038_v25  ;;  %v1322_v47 = vpack.c.bf16 %v1052_v44, %v1050_v42 }
 0x94d   :  { %699 = vrot.lane.b32.xlu0 %v698_v49, %s1426_s20  ;;  %1311 = vmatpush1.bf16.msra.mxu0 %v1310_v27 }
 0x94e   :  { %1313 = vmatprep.subr.bf16.mxu0 %v1312_v30 }
 0x951   :  { %1315 = vmatpush1.bf16.msra.mxu0 %v1314_v33 }
 0x952   :  { %1317 = vmatprep.subr.bf16.mxu0 %v1316_v36 }
 0x955   :  { %1319 = vmatpush1.bf16.msra.mxu0 %v1318_v39 }
 0x956   :  { %1321 = vmatprep.subr.bf16.mxu0 %v1320_v43 }
 0x959   :  { %1323 = vmatpush1.bf16.msra.mxu0 %v1322_v47 }
 0x95a   :  { %1325 = vmatprep.subr.bf16.mxu0 %v1324_v48 }
 0x9bf   :  { %v700_v16 = vpop.permute.xlu0 %699 }
 0x9c0   :  { %v1706_v14 = vadd.f32 %v700_v16, %v698_v49  ;;  %v1054_v49 = vld [vmem:[#allocation4 + $0x180] sm:$0xff] }
 0x9c1   :  { %v1326_v53 = vpack.c.bf16 %v1056_v50, %v1054_v49 }
 0x9c2   :  { %702 = vrot.lane.b32.xlu1 %v1706_v14, %s1431_s12 }
 0x9c3   :  { %1327 = vmatpush1.bf16.msra.mxu0 %v1326_v53 }
 0x9c4   :  { %1329 = vmatprep.subr.bf16.mxu0 %v1328_v54 }
 0x9c7   :  { %1331 = vmatpush1.bf16.msra.mxu0 %v1330_v59 }
 0x9c8   :  { %1333 = vmatprep.subr.bf16.mxu0 %v1332_v60 }
 0x9cb   :  { %1335 = vmatpush1.bf16.msra.mxu0 %v1334_v1 }
 0x9cc   :  { %1337 = vmatprep.subr.bf16.mxu0 %v1336_v2 }
 0x9cf   :  { %1339 = vmatpush1.bf16.msra.mxu0 %v1338_v5 }
 0xa34   :  { %v703_v7 = vpop.permute.xlu1 %702 }
 0xa35   :  { %v704_v13 = vadd.f32 %v703_v7, %v1706_v14 }
 0xa37   :  { %v705_v16 = vmul.f32 0.001953125, %v704_v13 }
 0xa39   :  { %v706_v15 = vadd.f32 0.0001, %v705_v16 }
 0xa3b   :  { %1398 = vrsqrt.f32 %v706_v15 }
 0xa45   :  { %v1399_v20 = vpop.eup %1398 }
 0xa46   :  { %v708_v21 = vmul.f32 %v1399_v20, %v648_v17 }
 0xa48   :  { %v713_v23 = vrot.slane %v708_v21, %v1576_v8 }
 0xa4a   :  { %v715_v14 = vmul.f32 %v713_v23, %v1687_v9  ;;  %v716_v25 = vmul.f32 %v713_v23, %v1689_v10  ;;  %v717_v26 = vmul.f32 %v713_v23, %v1691_v11  ;;  %v718_v27 = vmul.f32 %v713_v23, %v1693_v12 }
 0xa4c   :  { %v725_v29 = vadd.f32 %v1201_v24, %v715_v14  ;;  %v726_v30 = vadd.f32 %v1201_v24, %v716_v25  ;;  %v727_v31 = vadd.f32 %v1201_v24, %v717_v26  ;;  %v728_v32 = vadd.f32 %v1201_v24, %v718_v27 }
 0xa4e   :  { %v729_v33 = vmax.f32 %v725_v29, 0.0  ;;  %v730_v34 = vmax.f32 %v726_v30, 0.0  ;;  %v731_v35 = vmax.f32 %v727_v31, 0.0  ;;  %v732_v36 = vmax.f32 %v728_v32, 0.0 }
 0xa50   :  { %733 = vst [vmem:[%s1780_s8] sm:$0xff] %v729_v33  ;;  %734 = vst [vmem:[%s1780_s8 + $0x8] sm:$0xff] %v730_v34  ;;  %v741_v9 = vcombine.high %v729_v33, %v729_v33  ;;  %v748_v10 = vrot.slane %v729_v33, %v747_v28  ;;  %v775_v11 = vcombine.high %v731_v35, %v731_v35 }
 0xa51   :  { %735 = vst [vmem:[%s1780_s8 + $0x10] sm:$0xff] %v731_v35  ;;  %736 = vst [vmem:[%s1780_s8 + $0x18] sm:$0xff] %v732_v36  ;;  %v782_v12 = vrot.slane %v731_v35, %v747_v28  ;;  %v758_v37 = vcombine.high %v730_v34, %v730_v34  ;;  %v765_v38 = vrot.slane %v730_v34, %v747_v28 }
 0xa52   :  { %v792_v39 = vcombine.high %v732_v36, %v732_v36  ;;  %v755_v40 = vrot.slane %v741_v9, %v747_v28  ;;  %v756_v41 = vcombine.high %v748_v10, %v748_v10  ;;  %v789_v42 = vrot.slane %v775_v11, %v747_v28 }
 0xa53   :  { %v799_v43 = vrot.slane %v732_v36, %v747_v28  ;;  %v790_v44 = vcombine.high %v782_v12, %v782_v12  ;;  %v772_v48 = vrot.slane %v758_v37, %v747_v28  ;;  %v773_v51 = vcombine.high %v765_v38, %v765_v38 }
 0xa54   :  { %v757_v47 = vcombine.high %v755_v40, %v755_v40  ;;  %v791_v49 = vcombine.high %v789_v42, %v789_v42  ;;  %v806_v50 = vrot.slane %v792_v39, %v747_v28  ;;  %v1203_v52 = vrot.slane %v756_v41, 9 }
 0xa55   :  { %v807_v53 = vcombine.high %v799_v43, %v799_v43  ;;  %v1202_v54 = vrot.slane %v748_v10, 9  ;;  %v1204_v55 = vrot.slane %v755_v40, 9  ;;  %v1210_v57 = vrot.slane %v782_v12, 9 }
 0xa56   :  { %v1205_v56 = vrot.slane %v757_v47, 9  ;;  %v1211_v58 = vrot.slane %v790_v44, 9  ;;  %v1212_v59 = vrot.slane %v789_v42, 9  ;;  %v1213_v60 = vrot.slane %v791_v49, 9 }
 0xa57   :  { %v774_v61 = vcombine.high %v772_v48, %v772_v48  ;;  %v808_v62 = vcombine.high %v806_v50, %v806_v50  ;;  %v1206_v0 = vrot.slane %v765_v38, 9  ;;  %v1207_v1 = vrot.slane %v773_v51, 9 }
 0xa58   :  { %v1214_v2 = vrot.slane %v799_v43, 9  ;;  %v874_v3 = vmax.f32 %v756_v41, %v1203_v52  ;;  %v1215_v4 = vrot.slane %v807_v53, 9  ;;  %v873_v5 = vmax.f32 %v748_v10, %v1202_v54 }
 0xa59   :  { %v875_v7 = vmax.f32 %v755_v40, %v1204_v55  ;;  %v876_v13 = vmax.f32 %v757_v47, %v1205_v56  ;;  %v881_v16 = vmax.f32 %v782_v12, %v1210_v57  ;;  %v882_v15 = vmax.f32 %v790_v44, %v1211_v58 }
 0xa5a   :  { %v883_v17 = vmax.f32 %v789_v42, %v1212_v59  ;;  %v884_v18 = vmax.f32 %v791_v49, %v1213_v60  ;;  %v1208_v19 = vrot.slane %v772_v48, 9  ;;  %v1209_v20 = vrot.slane %v774_v61, 9 }
 0xa5b   :  { %v1216_v21 = vrot.slane %v806_v50, 9  ;;  %v1217_v22 = vrot.slane %v808_v62, 9  ;;  %v877_v23 = vmax.f32 %v765_v38, %v1206_v0  ;;  %v878_v24 = vmax.f32 %v773_v51, %v1207_v1 }
 0xa5c   :  { %v885_v14 = vmax.f32 %v799_v43, %v1214_v2  ;;  %v912_v25 = vrot.slane %v874_v3, %v1576_v8  ;;  %v886_v26 = vmax.f32 %v807_v53, %v1215_v4  ;;  %v908_v27 = vrot.slane %v873_v5, %v1576_v8 }
 0xa5d   :  { %v916_v28 = vrot.slane %v875_v7, %v1576_v8  ;;  %v920_v29 = vrot.slane %v876_v13, %v1576_v8  ;;  %v940_v30 = vrot.slane %v881_v16, %v1576_v8  ;;  %v944_v31 = vrot.slane %v882_v15, %v1576_v8 }
 0xa5e   :  { %v948_v32 = vrot.slane %v883_v17, %v1576_v8  ;;  %v952_v33 = vrot.slane %v884_v18, %v1576_v8  ;;  %v879_v34 = vmax.f32 %v772_v48, %v1208_v19  ;;  %v887_v35 = vmax.f32 %v806_v50, %v1216_v21 }
 0xa5f   :  { %v997_v36 = vsub.s32 %v994_v63, %v1573_v6  ;;  %v880_v9 = vmax.f32 %v774_v61, %v1209_v20  ;;  %v888_v10 = vmax.f32 %v808_v62, %v1217_v22  ;;  %v970_v11 = vsel %vm969_vm2, %v912_v25, %v908_v27 }
 0xa60   :  { %v983_v12 = vsel %vm969_vm2, %v944_v31, %v940_v30  ;;  %v924_v37 = vrot.slane %v877_v23, %v1576_v8  ;;  %v956_v38 = vrot.slane %v885_v14, %v1576_v8  ;;  %v972_v39 = vsel %vm971_vm3, %v916_v28, %v970_v11 }
 0xa61   :  { %v984_v40 = vsel %vm971_vm3, %v948_v32, %v983_v12  ;;  %v928_v41 = vrot.slane %v878_v24, %v1576_v8  ;;  %v960_v42 = vrot.slane %v886_v26, %v1576_v8  ;;  %v974_v6 = vsel %vm973_vm4, %v920_v29, %v972_v39 }
 0xa62   :  { %v985_v43 = vsel %vm973_vm4, %v952_v33, %v984_v40  ;;  %v932_v44 = vrot.slane %v879_v34, %v1576_v8  ;;  %v964_v45 = vrot.slane %v887_v35, %v1576_v8  ;;  %v976_v46 = vsel %vm975_vm5, %v924_v37, %v974_v6 }
 0xa63   :  { %v986_v47 = vsel %vm975_vm5, %v956_v38, %v985_v43  ;;  %v936_v48 = vrot.slane %v880_v9, %v1576_v8  ;;  %v968_v49 = vrot.slane %v888_v10, %v1576_v8  ;;  %v978_v50 = vsel %vm977_vm6, %v928_v41, %v976_v46 }
 0xa64   :  { %v987_v51 = vsel %vm977_vm6, %v960_v42, %v986_v47  ;;  %v980_v52 = vsel %vm979_vm7, %v932_v44, %v978_v50 }
 0xa65   :  { %v988_v53 = vsel %vm979_vm7, %v964_v45, %v987_v51  ;;  %v982_v54 = vsel %vm981_vm8, %v936_v48, %v980_v52 }
 0xa66   :  { %v989_v55 = vsel %vm981_vm8, %v968_v49, %v988_v53  ;;  %v998_v56 = vrot.slane %v982_v54, %v997_v36 }
 0xa67   :  { %v1005_v57 = vrot.slane %v989_v55, %v997_v36 }
 0xa69   :  { %v1072_v58 = vcombine.low %v998_v56, %v1005_v57  ;;  %v1073_v59 = vcombine.high %v998_v56, %v1005_v57 }
 0xa6b   :  { %1140 = vmatprep.mubr.f32.mxu0 %v1073_v59 }
 0xa6c   :  { %1141 = vmatmul.mubr.f32.vlgmr.msra.gmra.mrb[8].mxu0 %v1072_v58 }
 0xb3f   :  { %v1142_v60 = vpop.f32.mrb[8].mxu0 }
 0xb40   :  { %v1144_v8 = vpop.f32.mrb[9].mxu0 }
 0xb41   :  { %v1147_v61 = vmax.f32 %v1142_v60, %v1144_v8 }
 0xb43   :  { %v1149_v62 = vcombine.high %v1147_v61, %v1147_v61  ;;  %1151 = vst [vmem:[%s1781_s9] sm:$0xf] %v1147_v61 }
 0xb45   :  { %1152 = vst [vmem:[%s1781_s9 + $0x4] sm:$0xf] %v1149_v62 }
 0xb46   :  { %1161 = vsyncpa [#allocation5], 1 }

</bundles_post_ra>
